<compile_context>
chip_gen: v7x
topology: tpu7x:2x2x1
jax: 0.10.0
libtpu: 0.0.40
codegen_flags: <defaults>
</compile_context>

<pallas_src>
import jax
import jax.numpy as jnp
from jax.experimental import pallas as pl
from jax.experimental.pallas import tpu as pltpu

LANES = 128
SUBLANES = 8


def shallow_nn_kernel(w1_ref, b1_ref, w2_ref, b2_ref, x_ref, o_ref):
    # w1_ref, b1_ref, w2_ref: (H,) f32 in SMEM; b2_ref: (1,) f32 in SMEM.
    # x_ref, o_ref: (block_rows, 128) f32 lane-dense batch tiles in VMEM.
    x = x_ref[...]
    H = w1_ref.shape[0]
    acc = jnp.full_like(x, b2_ref[0])
    # H is small and static (e.g. 32): fully unrolled chain of VPU broadcast FMAs.
    for h in range(H):
        acc = acc + w2_ref[h] * jnp.maximum(w1_ref[h] * x + b1_ref[h], 0.0)
    # exp lowers to the EUP slot, which is otherwise idle next to the VPU work.
    o_ref[...] = jax.nn.sigmoid(acc).astype(o_ref.dtype)


def shallow_nn_forward(x, w1, b1, w2, b2, *, max_block_rows=512):
    """x: (B,1) f32; w1: (H,1); b1: (H,); w2: (1,H); b2: (1,) — PyTorch layouts."""
    B = x.shape[0]

    # --- lane-dense re-layout of the batch (glue, outside the kernel) ---
    rows = pl.cdiv(B, LANES)
    rows = ((rows + SUBLANES - 1) // SUBLANES) * SUBLANES        # honor (8,128) tiling
    block_rows = min(max_block_rows, rows)                       # big tiles, VMEM-safe
    rows = ((rows + block_rows - 1) // block_rows) * block_rows  # grid-even
    b_pad = rows * LANES
    x2d = jnp.pad(x.reshape(-1), (0, b_pad - B)).reshape(rows, LANES)

    smem = pl.BlockSpec(memory_space=pltpu.MemorySpace.SMEM)     # tiny params, no vreg waste
    tile = pl.BlockSpec((block_rows, LANES), lambda i: (i, 0))   # lane-dense batch tile

    out2d = pl.pallas_call(
        shallow_nn_kernel,
        out_shape=jax.ShapeDtypeStruct((rows, LANES), jnp.float32),
        grid=(rows // block_rows,),
        in_specs=[smem, smem, smem, smem, tile],
        out_specs=tile,
        compiler_params=pltpu.CompilerParams(
            dimension_semantics=("parallel",),  # v7x: shard batch tiles across both TCs
        ),
    )(w1.reshape(-1), b1.reshape(-1), w2.reshape(-1), b2.reshape(-1), x2d)

    return out2d.reshape(-1)[:B].reshape(B, 1)


def reference_forward(x, w1, b1, w2, b2):
    h = jnp.maximum(x @ w1.T + b1, 0.0)
    return jax.nn.sigmoid(h @ w2.T + b2)


if __name__ == "__main__":
    layer_size = 32
    batch = 1000  # deliberately not a multiple of 128 to exercise the padding path

    key = jax.random.PRNGKey(0)
    kx, k1, k2, k3, k4 = jax.random.split(key, 5)

    # Deterministic parameter init (PyTorch-like uniform(-1/sqrt(fan_in), 1/sqrt(fan_in))).
    x = jax.random.normal(kx, (batch, 1), dtype=jnp.float32)
    w1 = jax.random.uniform(k1, (layer_size, 1), minval=-1.0, maxval=1.0, dtype=jnp.float32)
    b1 = jax.random.uniform(k2, (layer_size,), minval=-1.0, maxval=1.0, dtype=jnp.float32)
    bound2 = 1.0 / jnp.sqrt(layer_size)
    w2 = jax.random.uniform(k3, (1, layer_size), minval=-bound2, maxval=bound2, dtype=jnp.float32)
    b2 = jax.random.uniform(k4, (1,), minval=-bound2, maxval=bound2, dtype=jnp.float32)

    out = shallow_nn_forward(x, w1, b1, w2, b2)
    out = jax.block_until_ready(out)

    ref = reference_forward(x, w1, b1, w2, b2)
    assert out.shape == (batch, 1)
    assert jnp.allclose(out, ref, atol=1e-5, rtol=1e-5), "mismatch vs reference"

    print("KERNEL_OK")
</pallas_src>

<mosaic_0001>
module attributes {stable_mosaic.version = 11 : i64} {
  func.func @shallow_nn_kernel(%arg0: i32, %arg1: memref<32xf32, #tpu.memory_space<smem>>, %arg2: memref<32xf32, #tpu.memory_space<smem>>, %arg3: memref<32xf32, #tpu.memory_space<smem>>, %arg4: memref<1xf32, #tpu.memory_space<smem>>, %arg5: memref<8x128xf32, #tpu.memory_space<vmem>>, %arg6: memref<8x128xf32, #tpu.memory_space<vmem>>) attributes {dimension_semantics = [#tpu.dimension_semantics<parallel>], iteration_bounds = array<i64: 1>, scalar_prefetch = 0 : i64, scratch_operands = 0 : i64, tpu.core_type = #tpu.core_type<tc>, window_params = [{transform_indices = @transform_0, window_bounds = array<i64: 32>}, {transform_indices = @transform_1, window_bounds = array<i64: 32>}, {transform_indices = @transform_2, window_bounds = array<i64: 32>}, {transform_indices = @transform_3, window_bounds = array<i64: 1>}, {transform_indices = @transform_4, window_bounds = array<i64: 8, 128>}, {transform_indices = @transform_5, window_bounds = array<i64: 8, 128>}]} {
    %c0 = arith.constant 0 : index
    %c0_0 = arith.constant 0 : index
    %0 = vector.load %arg5[%c0, %c0_0] : memref<8x128xf32, #tpu.memory_space<vmem>>, vector<8x128xf32>
    %c0_1 = arith.constant 0 : index
    %1 = memref.load %arg4[%c0_1] : memref<1xf32, #tpu.memory_space<smem>>
    %2 = vector.broadcast %1 : f32 to vector<8x128xf32>
    %c0_2 = arith.constant 0 : index
    %3 = memref.load %arg3[%c0_2] : memref<32xf32, #tpu.memory_space<smem>>
    %c0_3 = arith.constant 0 : index
    %4 = memref.load %arg1[%c0_3] : memref<32xf32, #tpu.memory_space<smem>>
    %5 = vector.broadcast %4 : f32 to vector<8x128xf32>
    %6 = arith.mulf %5, %0 : vector<8x128xf32>
    %c0_4 = arith.constant 0 : index
    %7 = memref.load %arg2[%c0_4] : memref<32xf32, #tpu.memory_space<smem>>
    %8 = vector.broadcast %7 : f32 to vector<8x128xf32>
    %9 = arith.addf %6, %8 : vector<8x128xf32>
    %cst = arith.constant 0.000000e+00 : f32
    %10 = vector.broadcast %cst : f32 to vector<8x128xf32>
    %11 = arith.maximumf %9, %10 : vector<8x128xf32>
    %12 = vector.broadcast %3 : f32 to vector<8x128xf32>
    %13 = arith.mulf %12, %11 : vector<8x128xf32>
    %14 = arith.addf %2, %13 : vector<8x128xf32>
    %c1 = arith.constant 1 : index
    %15 = memref.load %arg3[%c1] : memref<32xf32, #tpu.memory_space<smem>>
    %c1_5 = arith.constant 1 : index
    %16 = memref.load %arg1[%c1_5] : memref<32xf32, #tpu.memory_space<smem>>
    %17 = vector.broadcast %16 : f32 to vector<8x128xf32>
    %18 = arith.mulf %17, %0 : vector<8x128xf32>
    %c1_6 = arith.constant 1 : index
    %19 = memref.load %arg2[%c1_6] : memref<32xf32, #tpu.memory_space<smem>>
    %20 = vector.broadcast %19 : f32 to vector<8x128xf32>
    %21 = arith.addf %18, %20 : vector<8x128xf32>
    %cst_7 = arith.constant 0.000000e+00 : f32
    %22 = vector.broadcast %cst_7 : f32 to vector<8x128xf32>
    %23 = arith.maximumf %21, %22 : vector<8x128xf32>
    %24 = vector.broadcast %15 : f32 to vector<8x128xf32>
    %25 = arith.mulf %24, %23 : vector<8x128xf32>
    %26 = arith.addf %14, %25 : vector<8x128xf32>
    %c2 = arith.constant 2 : index
    %27 = memref.load %arg3[%c2] : memref<32xf32, #tpu.memory_space<smem>>
    %c2_8 = arith.constant 2 : index
    %28 = memref.load %arg1[%c2_8] : memref<32xf32, #tpu.memory_space<smem>>
    %29 = vector.broadcast %28 : f32 to vector<8x128xf32>
    %30 = arith.mulf %29, %0 : vector<8x128xf32>
    %c2_9 = arith.constant 2 : index
    %31 = memref.load %arg2[%c2_9] : memref<32xf32, #tpu.memory_space<smem>>
    %32 = vector.broadcast %31 : f32 to vector<8x128xf32>
    %33 = arith.addf %30, %32 : vector<8x128xf32>
    %cst_10 = arith.constant 0.000000e+00 : f32
    %34 = vector.broadcast %cst_10 : f32 to vector<8x128xf32>
    %35 = arith.maximumf %33, %34 : vector<8x128xf32>
    %36 = vector.broadcast %27 : f32 to vector<8x128xf32>
    %37 = arith.mulf %36, %35 : vector<8x128xf32>
    %38 = arith.addf %26, %37 : vector<8x128xf32>
    %c3 = arith.constant 3 : index
    %39 = memref.load %arg3[%c3] : memref<32xf32, #tpu.memory_space<smem>>
    %c3_11 = arith.constant 3 : index
    %40 = memref.load %arg1[%c3_11] : memref<32xf32, #tpu.memory_space<smem>>
    %41 = vector.broadcast %40 : f32 to vector<8x128xf32>
    %42 = arith.mulf %41, %0 : vector<8x128xf32>
    %c3_12 = arith.constant 3 : index
    %43 = memref.load %arg2[%c3_12] : memref<32xf32, #tpu.memory_space<smem>>
    %44 = vector.broadcast %43 : f32 to vector<8x128xf32>
    %45 = arith.addf %42, %44 : vector<8x128xf32>
    %cst_13 = arith.constant 0.000000e+00 : f32
    %46 = vector.broadcast %cst_13 : f32 to vector<8x128xf32>
    %47 = arith.maximumf %45, %46 : vector<8x128xf32>
    %48 = vector.broadcast %39 : f32 to vector<8x128xf32>
    %49 = arith.mulf %48, %47 : vector<8x128xf32>
    %50 = arith.addf %38, %49 : vector<8x128xf32>
    %c4 = arith.constant 4 : index
    %51 = memref.load %arg3[%c4] : memref<32xf32, #tpu.memory_space<smem>>
    %c4_14 = arith.constant 4 : index
    %52 = memref.load %arg1[%c4_14] : memref<32xf32, #tpu.memory_space<smem>>
    %53 = vector.broadcast %52 : f32 to vector<8x128xf32>
    %54 = arith.mulf %53, %0 : vector<8x128xf32>
    %c4_15 = arith.constant 4 : index
    %55 = memref.load %arg2[%c4_15] : memref<32xf32, #tpu.memory_space<smem>>
    %56 = vector.broadcast %55 : f32 to vector<8x128xf32>
    %57 = arith.addf %54, %56 : vector<8x128xf32>
    %cst_16 = arith.constant 0.000000e+00 : f32
    %58 = vector.broadcast %cst_16 : f32 to vector<8x128xf32>
    %59 = arith.maximumf %57, %58 : vector<8x128xf32>
    %60 = vector.broadcast %51 : f32 to vector<8x128xf32>
    %61 = arith.mulf %60, %59 : vector<8x128xf32>
    %62 = arith.addf %50, %61 : vector<8x128xf32>
    %c5 = arith.constant 5 : index
    %63 = memref.load %arg3[%c5] : memref<32xf32, #tpu.memory_space<smem>>
    %c5_17 = arith.constant 5 : index
    %64 = memref.load %arg1[%c5_17] : memref<32xf32, #tpu.memory_space<smem>>
    %65 = vector.broadcast %64 : f32 to vector<8x128xf32>
    %66 = arith.mulf %65, %0 : vector<8x128xf32>
    %c5_18 = arith.constant 5 : index
    %67 = memref.load %arg2[%c5_18] : memref<32xf32, #tpu.memory_space<smem>>
    %68 = vector.broadcast %67 : f32 to vector<8x128xf32>
    %69 = arith.addf %66, %68 : vector<8x128xf32>
    %cst_19 = arith.constant 0.000000e+00 : f32
    %70 = vector.broadcast %cst_19 : f32 to vector<8x128xf32>
    %71 = arith.maximumf %69, %70 : vector<8x128xf32>
    %72 = vector.broadcast %63 : f32 to vector<8x128xf32>
    %73 = arith.mulf %72, %71 : vector<8x128xf32>
    %74 = arith.addf %62, %73 : vector<8x128xf32>
    %c6 = arith.constant 6 : index
    %75 = memref.load %arg3[%c6] : memref<32xf32, #tpu.memory_space<smem>>
    %c6_20 = arith.constant 6 : index
    %76 = memref.load %arg1[%c6_20] : memref<32xf32, #tpu.memory_space<smem>>
    %77 = vector.broadcast %76 : f32 to vector<8x128xf32>
    %78 = arith.mulf %77, %0 : vector<8x128xf32>
    %c6_21 = arith.constant 6 : index
    %79 = memref.load %arg2[%c6_21] : memref<32xf32, #tpu.memory_space<smem>>
    %80 = vector.broadcast %79 : f32 to vector<8x128xf32>
    %81 = arith.addf %78, %80 : vector<8x128xf32>
    %cst_22 = arith.constant 0.000000e+00 : f32
    %82 = vector.broadcast %cst_22 : f32 to vector<8x128xf32>
    %83 = arith.maximumf %81, %82 : vector<8x128xf32>
    %84 = vector.broadcast %75 : f32 to vector<8x128xf32>
    %85 = arith.mulf %84, %83 : vector<8x128xf32>
    %86 = arith.addf %74, %85 : vector<8x128xf32>
    %c7 = arith.constant 7 : index
    %87 = memref.load %arg3[%c7] : memref<32xf32, #tpu.memory_space<smem>>
    %c7_23 = arith.constant 7 : index
    %88 = memref.load %arg1[%c7_23] : memref<32xf32, #tpu.memory_space<smem>>
    %89 = vector.broadcast %88 : f32 to vector<8x128xf32>
    %90 = arith.mulf %89, %0 : vector<8x128xf32>
    %c7_24 = arith.constant 7 : index
    %91 = memref.load %arg2[%c7_24] : memref<32xf32, #tpu.memory_space<smem>>
    %92 = vector.broadcast %91 : f32 to vector<8x128xf32>
    %93 = arith.addf %90, %92 : vector<8x128xf32>
    %cst_25 = arith.constant 0.000000e+00 : f32
    %94 = vector.broadcast %cst_25 : f32 to vector<8x128xf32>
    %95 = arith.maximumf %93, %94 : vector<8x128xf32>
    %96 = vector.broadcast %87 : f32 to vector<8x128xf32>
    %97 = arith.mulf %96, %95 : vector<8x128xf32>
    %98 = arith.addf %86, %97 : vector<8x128xf32>
    %c8 = arith.constant 8 : index
    %99 = memref.load %arg3[%c8] : memref<32xf32, #tpu.memory_space<smem>>
    %c8_26 = arith.constant 8 : index
    %100 = memref.load %arg1[%c8_26] : memref<32xf32, #tpu.memory_space<smem>>
    %101 = vector.broadcast %100 : f32 to vector<8x128xf32>
    %102 = arith.mulf %101, %0 : vector<8x128xf32>
    %c8_27 = arith.constant 8 : index
    %103 = memref.load %arg2[%c8_27] : memref<32xf32, #tpu.memory_space<smem>>
    %104 = vector.broadcast %103 : f32 to vector<8x128xf32>
    %105 = arith.addf %102, %104 : vector<8x128xf32>
    %cst_28 = arith.constant 0.000000e+00 : f32
    %106 = vector.broadcast %cst_28 : f32 to vector<8x128xf32>
    %107 = arith.maximumf %105, %106 : vector<8x128xf32>
    %108 = vector.broadcast %99 : f32 to vector<8x128xf32>
    %109 = arith.mulf %108, %107 : vector<8x128xf32>
    %110 = arith.addf %98, %109 : vector<8x128xf32>
    %c9 = arith.constant 9 : index
    %111 = memref.load %arg3[%c9] : memref<32xf32, #tpu.memory_space<smem>>
    %c9_29 = arith.constant 9 : index
    %112 = memref.load %arg1[%c9_29] : memref<32xf32, #tpu.memory_space<smem>>
    %113 = vector.broadcast %112 : f32 to vector<8x128xf32>
    %114 = arith.mulf %113, %0 : vector<8x128xf32>
    %c9_30 = arith.constant 9 : index
    %115 = memref.load %arg2[%c9_30] : memref<32xf32, #tpu.memory_space<smem>>
    %116 = vector.broadcast %115 : f32 to vector<8x128xf32>
    %117 = arith.addf %114, %116 : vector<8x128xf32>
    %cst_31 = arith.constant 0.000000e+00 : f32
    %118 = vector.broadcast %cst_31 : f32 to vector<8x128xf32>
    %119 = arith.maximumf %117, %118 : vector<8x128xf32>
    %120 = vector.broadcast %111 : f32 to vector<8x128xf32>
    %121 = arith.mulf %120, %119 : vector<8x128xf32>
    %122 = arith.addf %110, %121 : vector<8x128xf32>
    %c10 = arith.constant 10 : index
    %123 = memref.load %arg3[%c10] : memref<32xf32, #tpu.memory_space<smem>>
    %c10_32 = arith.constant 10 : index
    %124 = memref.load %arg1[%c10_32] : memref<32xf32, #tpu.memory_space<smem>>
    %125 = vector.broadcast %124 : f32 to vector<8x128xf32>
    %126 = arith.mulf %125, %0 : vector<8x128xf32>
    %c10_33 = arith.constant 10 : index
    %127 = memref.load %arg2[%c10_33] : memref<32xf32, #tpu.memory_space<smem>>
    %128 = vector.broadcast %127 : f32 to vector<8x128xf32>
    %129 = arith.addf %126, %128 : vector<8x128xf32>
    %cst_34 = arith.constant 0.000000e+00 : f32
    %130 = vector.broadcast %cst_34 : f32 to vector<8x128xf32>
    %131 = arith.maximumf %129, %130 : vector<8x128xf32>
    %132 = vector.broadcast %123 : f32 to vector<8x128xf32>
    %133 = arith.mulf %132, %131 : vector<8x128xf32>
    %134 = arith.addf %122, %133 : vector<8x128xf32>
    %c11 = arith.constant 11 : index
    %135 = memref.load %arg3[%c11] : memref<32xf32, #tpu.memory_space<smem>>
    %c11_35 = arith.constant 11 : index
    %136 = memref.load %arg1[%c11_35] : memref<32xf32, #tpu.memory_space<smem>>
    %137 = vector.broadcast %136 : f32 to vector<8x128xf32>
    %138 = arith.mulf %137, %0 : vector<8x128xf32>
    %c11_36 = arith.constant 11 : index
    %139 = memref.load %arg2[%c11_36] : memref<32xf32, #tpu.memory_space<smem>>
    %140 = vector.broadcast %139 : f32 to vector<8x128xf32>
    %141 = arith.addf %138, %140 : vector<8x128xf32>
    %cst_37 = arith.constant 0.000000e+00 : f32
    %142 = vector.broadcast %cst_37 : f32 to vector<8x128xf32>
    %143 = arith.maximumf %141, %142 : vector<8x128xf32>
    %144 = vector.broadcast %135 : f32 to vector<8x128xf32>
    %145 = arith.mulf %144, %143 : vector<8x128xf32>
    %146 = arith.addf %134, %145 : vector<8x128xf32>
    %c12 = arith.constant 12 : index
    %147 = memref.load %arg3[%c12] : memref<32xf32, #tpu.memory_space<smem>>
    %c12_38 = arith.constant 12 : index
    %148 = memref.load %arg1[%c12_38] : memref<32xf32, #tpu.memory_space<smem>>
    %149 = vector.broadcast %148 : f32 to vector<8x128xf32>
    %150 = arith.mulf %149, %0 : vector<8x128xf32>
    %c12_39 = arith.constant 12 : index
    %151 = memref.load %arg2[%c12_39] : memref<32xf32, #tpu.memory_space<smem>>
    %152 = vector.broadcast %151 : f32 to vector<8x128xf32>
    %153 = arith.addf %150, %152 : vector<8x128xf32>
    %cst_40 = arith.constant 0.000000e+00 : f32
    %154 = vector.broadcast %cst_40 : f32 to vector<8x128xf32>
    %155 = arith.maximumf %153, %154 : vector<8x128xf32>
    %156 = vector.broadcast %147 : f32 to vector<8x128xf32>
    %157 = arith.mulf %156, %155 : vector<8x128xf32>
    %158 = arith.addf %146, %157 : vector<8x128xf32>
    %c13 = arith.constant 13 : index
    %159 = memref.load %arg3[%c13] : memref<32xf32, #tpu.memory_space<smem>>
    %c13_41 = arith.constant 13 : index
    %160 = memref.load %arg1[%c13_41] : memref<32xf32, #tpu.memory_space<smem>>
    %161 = vector.broadcast %160 : f32 to vector<8x128xf32>
    %162 = arith.mulf %161, %0 : vector<8x128xf32>
    %c13_42 = arith.constant 13 : index
    %163 = memref.load %arg2[%c13_42] : memref<32xf32, #tpu.memory_space<smem>>
    %164 = vector.broadcast %163 : f32 to vector<8x128xf32>
    %165 = arith.addf %162, %164 : vector<8x128xf32>
    %cst_43 = arith.constant 0.000000e+00 : f32
    %166 = vector.broadcast %cst_43 : f32 to vector<8x128xf32>
    %167 = arith.maximumf %165, %166 : vector<8x128xf32>
    %168 = vector.broadcast %159 : f32 to vector<8x128xf32>
    %169 = arith.mulf %168, %167 : vector<8x128xf32>
    %170 = arith.addf %158, %169 : vector<8x128xf32>
    %c14 = arith.constant 14 : index
    %171 = memref.load %arg3[%c14] : memref<32xf32, #tpu.memory_space<smem>>
    %c14_44 = arith.constant 14 : index
    %172 = memref.load %arg1[%c14_44] : memref<32xf32, #tpu.memory_space<smem>>
    %173 = vector.broadcast %172 : f32 to vector<8x128xf32>
    %174 = arith.mulf %173, %0 : vector<8x128xf32>
    %c14_45 = arith.constant 14 : index
    %175 = memref.load %arg2[%c14_45] : memref<32xf32, #tpu.memory_space<smem>>
    %176 = vector.broadcast %175 : f32 to vector<8x128xf32>
    %177 = arith.addf %174, %176 : vector<8x128xf32>
    %cst_46 = arith.constant 0.000000e+00 : f32
    %178 = vector.broadcast %cst_46 : f32 to vector<8x128xf32>
    %179 = arith.maximumf %177, %178 : vector<8x128xf32>
    %180 = vector.broadcast %171 : f32 to vector<8x128xf32>
    %181 = arith.mulf %180, %179 : vector<8x128xf32>
    %182 = arith.addf %170, %181 : vector<8x128xf32>
    %c15 = arith.constant 15 : index
    %183 = memref.load %arg3[%c15] : memref<32xf32, #tpu.memory_space<smem>>
    %c15_47 = arith.constant 15 : index
    %184 = memref.load %arg1[%c15_47] : memref<32xf32, #tpu.memory_space<smem>>
    %185 = vector.broadcast %184 : f32 to vector<8x128xf32>
    %186 = arith.mulf %185, %0 : vector<8x128xf32>
    %c15_48 = arith.constant 15 : index
    %187 = memref.load %arg2[%c15_48] : memref<32xf32, #tpu.memory_space<smem>>
    %188 = vector.broadcast %187 : f32 to vector<8x128xf32>
    %189 = arith.addf %186, %188 : vector<8x128xf32>
    %cst_49 = arith.constant 0.000000e+00 : f32
    %190 = vector.broadcast %cst_49 : f32 to vector<8x128xf32>
    %191 = arith.maximumf %189, %190 : vector<8x128xf32>
    %192 = vector.broadcast %183 : f32 to vector<8x128xf32>
    %193 = arith.mulf %192, %191 : vector<8x128xf32>
    %194 = arith.addf %182, %193 : vector<8x128xf32>
    %c16 = arith.constant 16 : index
    %195 = memref.load %arg3[%c16] : memref<32xf32, #tpu.memory_space<smem>>
    %c16_50 = arith.constant 16 : index
    %196 = memref.load %arg1[%c16_50] : memref<32xf32, #tpu.memory_space<smem>>
    %197 = vector.broadcast %196 : f32 to vector<8x128xf32>
    %198 = arith.mulf %197, %0 : vector<8x128xf32>
    %c16_51 = arith.constant 16 : index
    %199 = memref.load %arg2[%c16_51] : memref<32xf32, #tpu.memory_space<smem>>
    %200 = vector.broadcast %199 : f32 to vector<8x128xf32>
    %201 = arith.addf %198, %200 : vector<8x128xf32>
    %cst_52 = arith.constant 0.000000e+00 : f32
    %202 = vector.broadcast %cst_52 : f32 to vector<8x128xf32>
    %203 = arith.maximumf %201, %202 : vector<8x128xf32>
    %204 = vector.broadcast %195 : f32 to vector<8x128xf32>
    %205 = arith.mulf %204, %203 : vector<8x128xf32>
    %206 = arith.addf %194, %205 : vector<8x128xf32>
    %c17 = arith.constant 17 : index
    %207 = memref.load %arg3[%c17] : memref<32xf32, #tpu.memory_space<smem>>
    %c17_53 = arith.constant 17 : index
    %208 = memref.load %arg1[%c17_53] : memref<32xf32, #tpu.memory_space<smem>>
    %209 = vector.broadcast %208 : f32 to vector<8x128xf32>
    %210 = arith.mulf %209, %0 : vector<8x128xf32>
    %c17_54 = arith.constant 17 : index
    %211 = memref.load %arg2[%c17_54] : memref<32xf32, #tpu.memory_space<smem>>
    %212 = vector.broadcast %211 : f32 to vector<8x128xf32>
    %213 = arith.addf %210, %212 : vector<8x128xf32>
    %cst_55 = arith.constant 0.000000e+00 : f32
    %214 = vector.broadcast %cst_55 : f32 to vector<8x128xf32>
    %215 = arith.maximumf %213, %214 : vector<8x128xf32>
    %216 = vector.broadcast %207 : f32 to vector<8x128xf32>
    %217 = arith.mulf %216, %215 : vector<8x128xf32>
    %218 = arith.addf %206, %217 : vector<8x128xf32>
    %c18 = arith.constant 18 : index
    %219 = memref.load %arg3[%c18] : memref<32xf32, #tpu.memory_space<smem>>
    %c18_56 = arith.constant 18 : index
    %220 = memref.load %arg1[%c18_56] : memref<32xf32, #tpu.memory_space<smem>>
    %221 = vector.broadcast %220 : f32 to vector<8x128xf32>
    %222 = arith.mulf %221, %0 : vector<8x128xf32>
    %c18_57 = arith.constant 18 : index
    %223 = memref.load %arg2[%c18_57] : memref<32xf32, #tpu.memory_space<smem>>
    %224 = vector.broadcast %223 : f32 to vector<8x128xf32>
    %225 = arith.addf %222, %224 : vector<8x128xf32>
    %cst_58 = arith.constant 0.000000e+00 : f32
    %226 = vector.broadcast %cst_58 : f32 to vector<8x128xf32>
    %227 = arith.maximumf %225, %226 : vector<8x128xf32>
    %228 = vector.broadcast %219 : f32 to vector<8x128xf32>
    %229 = arith.mulf %228, %227 : vector<8x128xf32>
    %230 = arith.addf %218, %229 : vector<8x128xf32>
    %c19 = arith.constant 19 : index
    %231 = memref.load %arg3[%c19] : memref<32xf32, #tpu.memory_space<smem>>
    %c19_59 = arith.constant 19 : index
    %232 = memref.load %arg1[%c19_59] : memref<32xf32, #tpu.memory_space<smem>>
    %233 = vector.broadcast %232 : f32 to vector<8x128xf32>
    %234 = arith.mulf %233, %0 : vector<8x128xf32>
    %c19_60 = arith.constant 19 : index
    %235 = memref.load %arg2[%c19_60] : memref<32xf32, #tpu.memory_space<smem>>
    %236 = vector.broadcast %235 : f32 to vector<8x128xf32>
    %237 = arith.addf %234, %236 : vector<8x128xf32>
    %cst_61 = arith.constant 0.000000e+00 : f32
    %238 = vector.broadcast %cst_61 : f32 to vector<8x128xf32>
    %239 = arith.maximumf %237, %238 : vector<8x128xf32>
    %240 = vector.broadcast %231 : f32 to vector<8x128xf32>
    %241 = arith.mulf %240, %239 : vector<8x128xf32>
    %242 = arith.addf %230, %241 : vector<8x128xf32>
    %c20 = arith.constant 20 : index
    %243 = memref.load %arg3[%c20] : memref<32xf32, #tpu.memory_space<smem>>
    %c20_62 = arith.constant 20 : index
    %244 = memref.load %arg1[%c20_62] : memref<32xf32, #tpu.memory_space<smem>>
    %245 = vector.broadcast %244 : f32 to vector<8x128xf32>
    %246 = arith.mulf %245, %0 : vector<8x128xf32>
    %c20_63 = arith.constant 20 : index
    %247 = memref.load %arg2[%c20_63] : memref<32xf32, #tpu.memory_space<smem>>
    %248 = vector.broadcast %247 : f32 to vector<8x128xf32>
    %249 = arith.addf %246, %248 : vector<8x128xf32>
    %cst_64 = arith.constant 0.000000e+00 : f32
    %250 = vector.broadcast %cst_64 : f32 to vector<8x128xf32>
    %251 = arith.maximumf %249, %250 : vector<8x128xf32>
    %252 = vector.broadcast %243 : f32 to vector<8x128xf32>
    %253 = arith.mulf %252, %251 : vector<8x128xf32>
    %254 = arith.addf %242, %253 : vector<8x128xf32>
    %c21 = arith.constant 21 : index
    %255 = memref.load %arg3[%c21] : memref<32xf32, #tpu.memory_space<smem>>
    %c21_65 = arith.constant 21 : index
    %256 = memref.load %arg1[%c21_65] : memref<32xf32, #tpu.memory_space<smem>>
    %257 = vector.broadcast %256 : f32 to vector<8x128xf32>
    %258 = arith.mulf %257, %0 : vector<8x128xf32>
    %c21_66 = arith.constant 21 : index
    %259 = memref.load %arg2[%c21_66] : memref<32xf32, #tpu.memory_space<smem>>
    %260 = vector.broadcast %259 : f32 to vector<8x128xf32>
    %261 = arith.addf %258, %260 : vector<8x128xf32>
    %cst_67 = arith.constant 0.000000e+00 : f32
    %262 = vector.broadcast %cst_67 : f32 to vector<8x128xf32>
    %263 = arith.maximumf %261, %262 : vector<8x128xf32>
    %264 = vector.broadcast %255 : f32 to vector<8x128xf32>
    %265 = arith.mulf %264, %263 : vector<8x128xf32>
    %266 = arith.addf %254, %265 : vector<8x128xf32>
    %c22 = arith.constant 22 : index
    %267 = memref.load %arg3[%c22] : memref<32xf32, #tpu.memory_space<smem>>
    %c22_68 = arith.constant 22 : index
    %268 = memref.load %arg1[%c22_68] : memref<32xf32, #tpu.memory_space<smem>>
    %269 = vector.broadcast %268 : f32 to vector<8x128xf32>
    %270 = arith.mulf %269, %0 : vector<8x128xf32>
    %c22_69 = arith.constant 22 : index
    %271 = memref.load %arg2[%c22_69] : memref<32xf32, #tpu.memory_space<smem>>
    %272 = vector.broadcast %271 : f32 to vector<8x128xf32>
    %273 = arith.addf %270, %272 : vector<8x128xf32>
    %cst_70 = arith.constant 0.000000e+00 : f32
    %274 = vector.broadcast %cst_70 : f32 to vector<8x128xf32>
    %275 = arith.maximumf %273, %274 : vector<8x128xf32>
    %276 = vector.broadcast %267 : f32 to vector<8x128xf32>
    %277 = arith.mulf %276, %275 : vector<8x128xf32>
    %278 = arith.addf %266, %277 : vector<8x128xf32>
    %c23 = arith.constant 23 : index
    %279 = memref.load %arg3[%c23] : memref<32xf32, #tpu.memory_space<smem>>
    %c23_71 = arith.constant 23 : index
    %280 = memref.load %arg1[%c23_71] : memref<32xf32, #tpu.memory_space<smem>>
    %281 = vector.broadcast %280 : f32 to vector<8x128xf32>
    %282 = arith.mulf %281, %0 : vector<8x128xf32>
    %c23_72 = arith.constant 23 : index
    %283 = memref.load %arg2[%c23_72] : memref<32xf32, #tpu.memory_space<smem>>
    %284 = vector.broadcast %283 : f32 to vector<8x128xf32>
    %285 = arith.addf %282, %284 : vector<8x128xf32>
    %cst_73 = arith.constant 0.000000e+00 : f32
    %286 = vector.broadcast %cst_73 : f32 to vector<8x128xf32>
    %287 = arith.maximumf %285, %286 : vector<8x128xf32>
    %288 = vector.broadcast %279 : f32 to vector<8x128xf32>
    %289 = arith.mulf %288, %287 : vector<8x128xf32>
    %290 = arith.addf %278, %289 : vector<8x128xf32>
    %c24 = arith.constant 24 : index
    %291 = memref.load %arg3[%c24] : memref<32xf32, #tpu.memory_space<smem>>
    %c24_74 = arith.constant 24 : index
    %292 = memref.load %arg1[%c24_74] : memref<32xf32, #tpu.memory_space<smem>>
    %293 = vector.broadcast %292 : f32 to vector<8x128xf32>
    %294 = arith.mulf %293, %0 : vector<8x128xf32>
    %c24_75 = arith.constant 24 : index
    %295 = memref.load %arg2[%c24_75] : memref<32xf32, #tpu.memory_space<smem>>
    %296 = vector.broadcast %295 : f32 to vector<8x128xf32>
    %297 = arith.addf %294, %296 : vector<8x128xf32>
    %cst_76 = arith.constant 0.000000e+00 : f32
    %298 = vector.broadcast %cst_76 : f32 to vector<8x128xf32>
    %299 = arith.maximumf %297, %298 : vector<8x128xf32>
    %300 = vector.broadcast %291 : f32 to vector<8x128xf32>
    %301 = arith.mulf %300, %299 : vector<8x128xf32>
    %302 = arith.addf %290, %301 : vector<8x128xf32>
    %c25 = arith.constant 25 : index
    %303 = memref.load %arg3[%c25] : memref<32xf32, #tpu.memory_space<smem>>
    %c25_77 = arith.constant 25 : index
    %304 = memref.load %arg1[%c25_77] : memref<32xf32, #tpu.memory_space<smem>>
    %305 = vector.broadcast %304 : f32 to vector<8x128xf32>
    %306 = arith.mulf %305, %0 : vector<8x128xf32>
    %c25_78 = arith.constant 25 : index
    %307 = memref.load %arg2[%c25_78] : memref<32xf32, #tpu.memory_space<smem>>
    %308 = vector.broadcast %307 : f32 to vector<8x128xf32>
    %309 = arith.addf %306, %308 : vector<8x128xf32>
    %cst_79 = arith.constant 0.000000e+00 : f32
    %310 = vector.broadcast %cst_79 : f32 to vector<8x128xf32>
    %311 = arith.maximumf %309, %310 : vector<8x128xf32>
    %312 = vector.broadcast %303 : f32 to vector<8x128xf32>
    %313 = arith.mulf %312, %311 : vector<8x128xf32>
    %314 = arith.addf %302, %313 : vector<8x128xf32>
    %c26 = arith.constant 26 : index
    %315 = memref.load %arg3[%c26] : memref<32xf32, #tpu.memory_space<smem>>
    %c26_80 = arith.constant 26 : index
    %316 = memref.load %arg1[%c26_80] : memref<32xf32, #tpu.memory_space<smem>>
    %317 = vector.broadcast %316 : f32 to vector<8x128xf32>
    %318 = arith.mulf %317, %0 : vector<8x128xf32>
    %c26_81 = arith.constant 26 : index
    %319 = memref.load %arg2[%c26_81] : memref<32xf32, #tpu.memory_space<smem>>
    %320 = vector.broadcast %319 : f32 to vector<8x128xf32>
    %321 = arith.addf %318, %320 : vector<8x128xf32>
    %cst_82 = arith.constant 0.000000e+00 : f32
    %322 = vector.broadcast %cst_82 : f32 to vector<8x128xf32>
    %323 = arith.maximumf %321, %322 : vector<8x128xf32>
    %324 = vector.broadcast %315 : f32 to vector<8x128xf32>
    %325 = arith.mulf %324, %323 : vector<8x128xf32>
    %326 = arith.addf %314, %325 : vector<8x128xf32>
    %c27 = arith.constant 27 : index
    %327 = memref.load %arg3[%c27] : memref<32xf32, #tpu.memory_space<smem>>
    %c27_83 = arith.constant 27 : index
    %328 = memref.load %arg1[%c27_83] : memref<32xf32, #tpu.memory_space<smem>>
    %329 = vector.broadcast %328 : f32 to vector<8x128xf32>
    %330 = arith.mulf %329, %0 : vector<8x128xf32>
    %c27_84 = arith.constant 27 : index
    %331 = memref.load %arg2[%c27_84] : memref<32xf32, #tpu.memory_space<smem>>
    %332 = vector.broadcast %331 : f32 to vector<8x128xf32>
    %333 = arith.addf %330, %332 : vector<8x128xf32>
    %cst_85 = arith.constant 0.000000e+00 : f32
    %334 = vector.broadcast %cst_85 : f32 to vector<8x128xf32>
    %335 = arith.maximumf %333, %334 : vector<8x128xf32>
    %336 = vector.broadcast %327 : f32 to vector<8x128xf32>
    %337 = arith.mulf %336, %335 : vector<8x128xf32>
    %338 = arith.addf %326, %337 : vector<8x128xf32>
    %c28 = arith.constant 28 : index
    %339 = memref.load %arg3[%c28] : memref<32xf32, #tpu.memory_space<smem>>
    %c28_86 = arith.constant 28 : index
    %340 = memref.load %arg1[%c28_86] : memref<32xf32, #tpu.memory_space<smem>>
    %341 = vector.broadcast %340 : f32 to vector<8x128xf32>
    %342 = arith.mulf %341, %0 : vector<8x128xf32>
    %c28_87 = arith.constant 28 : index
    %343 = memref.load %arg2[%c28_87] : memref<32xf32, #tpu.memory_space<smem>>
    %344 = vector.broadcast %343 : f32 to vector<8x128xf32>
    %345 = arith.addf %342, %344 : vector<8x128xf32>
    %cst_88 = arith.constant 0.000000e+00 : f32
    %346 = vector.broadcast %cst_88 : f32 to vector<8x128xf32>
    %347 = arith.maximumf %345, %346 : vector<8x128xf32>
    %348 = vector.broadcast %339 : f32 to vector<8x128xf32>
    %349 = arith.mulf %348, %347 : vector<8x128xf32>
    %350 = arith.addf %338, %349 : vector<8x128xf32>
    %c29 = arith.constant 29 : index
    %351 = memref.load %arg3[%c29] : memref<32xf32, #tpu.memory_space<smem>>
    %c29_89 = arith.constant 29 : index
    %352 = memref.load %arg1[%c29_89] : memref<32xf32, #tpu.memory_space<smem>>
    %353 = vector.broadcast %352 : f32 to vector<8x128xf32>
    %354 = arith.mulf %353, %0 : vector<8x128xf32>
    %c29_90 = arith.constant 29 : index
    %355 = memref.load %arg2[%c29_90] : memref<32xf32, #tpu.memory_space<smem>>
    %356 = vector.broadcast %355 : f32 to vector<8x128xf32>
    %357 = arith.addf %354, %356 : vector<8x128xf32>
    %cst_91 = arith.constant 0.000000e+00 : f32
    %358 = vector.broadcast %cst_91 : f32 to vector<8x128xf32>
    %359 = arith.maximumf %357, %358 : vector<8x128xf32>
    %360 = vector.broadcast %351 : f32 to vector<8x128xf32>
    %361 = arith.mulf %360, %359 : vector<8x128xf32>
    %362 = arith.addf %350, %361 : vector<8x128xf32>
    %c30 = arith.constant 30 : index
    %363 = memref.load %arg3[%c30] : memref<32xf32, #tpu.memory_space<smem>>
    %c30_92 = arith.constant 30 : index
    %364 = memref.load %arg1[%c30_92] : memref<32xf32, #tpu.memory_space<smem>>
    %365 = vector.broadcast %364 : f32 to vector<8x128xf32>
    %366 = arith.mulf %365, %0 : vector<8x128xf32>
    %c30_93 = arith.constant 30 : index
    %367 = memref.load %arg2[%c30_93] : memref<32xf32, #tpu.memory_space<smem>>
    %368 = vector.broadcast %367 : f32 to vector<8x128xf32>
    %369 = arith.addf %366, %368 : vector<8x128xf32>
    %cst_94 = arith.constant 0.000000e+00 : f32
    %370 = vector.broadcast %cst_94 : f32 to vector<8x128xf32>
    %371 = arith.maximumf %369, %370 : vector<8x128xf32>
    %372 = vector.broadcast %363 : f32 to vector<8x128xf32>
    %373 = arith.mulf %372, %371 : vector<8x128xf32>
    %374 = arith.addf %362, %373 : vector<8x128xf32>
    %c31 = arith.constant 31 : index
    %375 = memref.load %arg3[%c31] : memref<32xf32, #tpu.memory_space<smem>>
    %c31_95 = arith.constant 31 : index
    %376 = memref.load %arg1[%c31_95] : memref<32xf32, #tpu.memory_space<smem>>
    %377 = vector.broadcast %376 : f32 to vector<8x128xf32>
    %378 = arith.mulf %377, %0 : vector<8x128xf32>
    %c31_96 = arith.constant 31 : index
    %379 = memref.load %arg2[%c31_96] : memref<32xf32, #tpu.memory_space<smem>>
    %380 = vector.broadcast %379 : f32 to vector<8x128xf32>
    %381 = arith.addf %378, %380 : vector<8x128xf32>
    %cst_97 = arith.constant 0.000000e+00 : f32
    %382 = vector.broadcast %cst_97 : f32 to vector<8x128xf32>
    %383 = arith.maximumf %381, %382 : vector<8x128xf32>
    %384 = vector.broadcast %375 : f32 to vector<8x128xf32>
    %385 = arith.mulf %384, %383 : vector<8x128xf32>
    %386 = arith.addf %374, %385 : vector<8x128xf32>
    %387 = arith.negf %386 : vector<8x128xf32>
    %388 = math.exp %387 : vector<8x128xf32>
    %cst_98 = arith.constant 1.000000e+00 : f32
    %389 = vector.broadcast %cst_98 : f32 to vector<8x128xf32>
    %390 = arith.addf %389, %388 : vector<8x128xf32>
    %391 = arith.divf %389, %390 : vector<8x128xf32>
    %c0_99 = arith.constant 0 : index
    %c0_100 = arith.constant 0 : index
    %392 = vector.load %arg6[%c0_99, %c0_100] : memref<8x128xf32, #tpu.memory_space<vmem>>, vector<8x128xf32>
    tpu.vector_store %arg6[%c0_99, %c0_100], %391 {strides = array<i32>} : memref<8x128xf32, #tpu.memory_space<vmem>>, vector<8x128xf32>,
    return
  }
  func.func @transform_0(%arg0: i32) -> i32 {
    %c0_i32 = arith.constant 0 : i32
    %c0_i32_0 = arith.constant 0 : i32
    return %c0_i32 : i32
  }
  func.func @transform_1(%arg0: i32) -> i32 {
    %c0_i32 = arith.constant 0 : i32
    %c0_i32_0 = arith.constant 0 : i32
    return %c0_i32 : i32
  }
  func.func @transform_2(%arg0: i32) -> i32 {
    %c0_i32 = arith.constant 0 : i32
    %c0_i32_0 = arith.constant 0 : i32
    return %c0_i32 : i32
  }
  func.func @transform_3(%arg0: i32) -> i32 {
    %c0_i32 = arith.constant 0 : i32
    %c0_i32_0 = arith.constant 0 : i32
    return %c0_i32 : i32
  }
  func.func @transform_4(%arg0: i32) -> (i32, i32) {
    %c0_i32 = arith.constant 0 : i32
    %c0_i32_0 = arith.constant 0 : i32
    return %arg0, %c0_i32 : i32, i32
  }
  func.func @transform_5(%arg0: i32) -> (i32, i32) {
    %c0_i32 = arith.constant 0 : i32
    %c0_i32_0 = arith.constant 0 : i32
    return %arg0, %c0_i32 : i32, i32
  }
}

</mosaic_0001>

<bundles_post_ra>
// kernel: tpu_custom_call.1
= control target key start
LH: loop header
LB: loop body
LE: loop exit
PB: predicated region body
PF: predicated region fallthrough
CT: control target
= control target key end

     0   :  { %11 = vsyncpa [#allocation5], 0  ;;  %s970_s0 = inlined_call_operand.vmem [shape: f32[32], index: 0, kind: input, shape index: {}]   ;;  %s971_s1 = inlined_call_operand.vmem [shape: f32[32], index: 1, kind: input, shape index: {}]   ;;  %s972_s2 = inlined_call_operand.vmem [shape: f32[32], index: 2, kind: input, shape index: {}]   ;;  %s973_s3 = inlined_call_operand.<no memory space> [shape: f32[1], index: 3, kind: input, shape index: {}]   ;;  %s974_s4 = inlined_call_operand.vmem [shape: f32[8,128], index: 4, kind: input, shape index: {}]   ;;  %s975_s5 = inlined_call_operand.hbm [shape: f32[8,128], index: 5, kind: output, shape index: {}]  }
   0x1   :  { %12 = vsyncpa [#allocation7], 0  ;;  %s30_s20 = sshll.u32 %s971_s1, 4  ;;  %s31_s20 = int_to_ptr.vmem [resolvable:$true] %s30_s20 }
   0x2   :  { %13 = vsyncpa [#allocation4], 0  ;;  %s20_s23 = sshll.u32 %s970_s0, 4  ;;  %s538_s24 = scalar_lea.vmem %s31_s20, 16  ;;  %s21_s23 = int_to_ptr.vmem [resolvable:$true] %s20_s23 }
   0x3   :  { %p539_p0 = scmp.ne.s32.totalorder %s31_s20, %s538_s24  ;;  %p543_p1 = scmp.lt.s32.totalorder %s31_s20, %s31_s20 }
   0x4   :  { %p544_p2 = scmp.lt.s32.totalorder %s538_s24, %s538_s24 }
   0x6   :  { %p545_p3 = por %p544_p2, %p543_p1 }
   0x8   :  { %p546_p4 = pnand %p545_p3, %p539_p0 }
   0xa   :  { %549 = shalt.err (!%p546_p4)
}
   0xb   :  { %s602_s25 = smov [#allocation6]   ;;  %s550_s26 = scalar_lea.vmem %s21_s23, 16 }
   0xc   :  { %33 = dma.vmem_to_smem %s31_s20, 16, %s602_s25, [#allocation7]  }
   0xd   :  { %p551_p5 = scmp.ne.s32.totalorder %s21_s23, %s550_s26  ;;  %p555_p6 = scmp.lt.s32.totalorder %s21_s23, %s21_s23 }
   0xe   :  { %p556_p7 = scmp.lt.s32.totalorder %s550_s26, %s550_s26 }
  0x10   :  { %p557_p8 = por %p556_p7, %p555_p6 }
  0x12   :  { %p558_p9 = pnand %p557_p8, %p551_p5 }
  0x14   :  { %561 = shalt.err (!%p558_p9)
}
  0x15   :  { %s603_s1 = smov [#allocation3]   ;;  %s40_s28 = sshll.u32 %s972_s2, 4  ;;  %s41_s28 = int_to_ptr.vmem [resolvable:$true] %s40_s28 }
  0x16   :  { %23 = dma.vmem_to_smem %s21_s23, 16, %s603_s1, [#allocation5]  }
  0x17   :  { %s562_s29 = scalar_lea.vmem %s41_s28, 16  ;;  %p567_p11 = scmp.lt.s32.totalorder %s41_s28, %s41_s28 }
  0x18   :  { %p563_p10 = scmp.ne.s32.totalorder %s41_s28, %s562_s29  ;;  %p568_p12 = scmp.lt.s32.totalorder %s562_s29, %s562_s29 }
  0x1a   :  { %p569_p13 = por %p568_p12, %p567_p11 }
  0x1c   :  { %p570_p0 = pnand %p569_p13, %p563_p10 }
  0x1e   :  { %573 = shalt.err (!%p570_p0)
}
  0x1f   :  { %s604_s30 = smov [#allocation8]  }
  0x20   :  { %43 = dma.vmem_to_smem %s41_s28, 16, %s604_s30, [#allocation7]  }
  0x21   :  { %596 = dma.done.wait [#allocation5], 16  }
  0x22   :  { %597 = vsyncadd [#allocation5], 4294967280 }
  0x23   :  { %598 = dma.done.wait [#allocation7], 32  }
  0x24   :  { %599 = vsyncadd [#allocation7], 4294967264 }
  0x25   :  { %57 = sfence }
  0x26   :  { %s645_s6 = sld [smem:[#allocation8]]  ;;  %s647_s2 = sld [smem:[#allocation8 + $0x1]]  ;;  %v656_v0 = vld [vmem:[%s974_s4] sm:$0xff]  ;;  %v60_v4 = vstv %s973_s3 }
  0x27   :  { %s62_s7 = sld [smem:[#allocation3]]  ;;  %s437_s9 = sld [smem:[#allocation3 + $0x1]] }
  0x28   :  { %s65_s8 = sld [smem:[#allocation6]]  ;;  %s649_s10 = sld [smem:[#allocation6 + $0x1]] }
  0x29   :  { %s651_s11 = sld [smem:[#allocation8 + $0x2]]  ;;  %s660_s16 = sld [smem:[#allocation8 + $0x3]] }
  0x2a   :  { %s440_s12 = sld [smem:[#allocation3 + $0x2]]  ;;  %s662_s17 = sld [smem:[#allocation3 + $0x3]] }
  0x2b   :  { %s658_s15 = sld [smem:[#allocation6 + $0x2]]  ;;  %s664_s18 = sld [smem:[#allocation6 + $0x3]] }
  0x2c   :  { %s666_s19 = sld [smem:[#allocation3 + $0x4]]  ;;  %s677_s23 = sld [smem:[#allocation3 + $0x5]]  ;;  %v69_v8 = vstv %s645_s6  ;;  %v80_v11 = vstv %s647_s2 }
  0x2d   :  { %v63_v1 = vstv %s62_s7  ;;  %s669_s4 = sld [smem:[#allocation8 + $0x4]]  ;;  %v74_v5 = vstv %s437_s9  ;;  %s679_s24 = sld [smem:[#allocation6 + $0x5]] }
  0x2e   :  { %v64_v2 = vmul.f32 %v63_v1, %v656_v0  ;;  %v66_v3 = vstv %s65_s8  ;;  %s671_s20 = sld [smem:[#allocation6 + $0x4]]  ;;  %v77_v6 = vstv %s649_s10  ;;  %v75_v9 = vmul.f32 %v74_v5, %v656_v0  ;;  %s683_s25 = sld [smem:[#allocation3 + $0x6]] }
  0x2f   :  { %v91_v14 = vstv %s651_s11  ;;  %s689_s3 = sld [smem:[#allocation8 + $0x5]]  ;;  %s691_s26 = sld [smem:[#allocation6 + $0x6]]  ;;  %v102_v21 = vstv %s660_s16 }
  0x30   :  { %v67_v7 = vadd.f32 %v66_v3, %v64_v2  ;;  %v85_v10 = vstv %s440_s12  ;;  %v78_v16 = vadd.f32 %v77_v6, %v75_v9  ;;  %v96_v17 = vstv %s662_s17  ;;  %s695_s1 = sld [smem:[#allocation8 + $0x6]]  ;;  %s697_s0 = sld [smem:[#allocation3 + $0x7]] }
  0x31   :  { %v86_v12 = vmul.f32 %v85_v10, %v656_v0  ;;  %v88_v13 = vstv %s658_s15  ;;  %v99_v18 = vstv %s664_s18  ;;  %v97_v20 = vmul.f32 %v96_v17, %v656_v0  ;;  %s702_s27 = sld [smem:[#allocation6 + $0x7]]  ;;  %s704_s28 = sld [smem:[#allocation3 + $0x8]] }
  0x32   :  { %v68_v15 = vmax.f32 %v67_v7, 0.0  ;;  %v107_v22 = vstv %s666_s19  ;;  %v79_v24 = vmax.f32 %v78_v16, 0.0  ;;  %s708_s29 = sld [smem:[#allocation8 + $0x7]]  ;;  %v118_v29 = vstv %s677_s23  ;;  %s712_s30 = sld [smem:[#allocation6 + $0x8]] }
  0x33   :  { %v89_v19 = vadd.f32 %v88_v13, %v86_v12  ;;  %v108_v25 = vmul.f32 %v107_v22, %v656_v0  ;;  %v100_v28 = vadd.f32 %v99_v18, %v97_v20  ;;  %v121_v30 = vstv %s679_s24  ;;  %s714_s6 = sld [smem:[#allocation3 + $0x9]]  ;;  %s717_s7 = sld [smem:[#allocation8 + $0x8]] }
  0x34   :  { %v70_v23 = vmul.f32 %v69_v8, %v68_v15  ;;  %v110_v26 = vstv %s671_s20  ;;  %v81_v32 = vmul.f32 %v80_v11, %v79_v24  ;;  %v119_v34 = vmul.f32 %v118_v29, %v656_v0  ;;  %s721_s8 = sld [smem:[#allocation6 + $0x9]]  ;;  %s723_s2 = sld [smem:[#allocation3 + $0xa]] }
  0x35   :  { %v90_v27 = vmax.f32 %v89_v19, 0.0  ;;  %v111_v33 = vadd.f32 %v110_v26, %v108_v25  ;;  %v101_v36 = vmax.f32 %v100_v28, 0.0  ;;  %v113_v37 = vstv %s669_s4  ;;  %s726_s9 = sld [smem:[#allocation8 + $0x9]]  ;;  %s731_s10 = sld [smem:[#allocation6 + $0xa]] }
  0x36   :  { %v71_v31 = vadd.f32 %v70_v23, %v60_v4  ;;  %v129_v38 = vstv %s683_s25  ;;  %v122_v41 = vadd.f32 %v121_v30, %v119_v34  ;;  %v124_v44 = vstv %s689_s3  ;;  %s733_s11 = sld [smem:[#allocation3 + $0xb]]  ;;  %s735_s12 = sld [smem:[#allocation8 + $0xa]] }
  0x37   :  { %v92_v35 = vmul.f32 %v91_v14, %v90_v27  ;;  %v112_v40 = vmax.f32 %v111_v33, 0.0  ;;  %v130_v42 = vmul.f32 %v129_v38, %v656_v0  ;;  %v103_v43 = vmul.f32 %v102_v21, %v101_v36  ;;  %s741_s13 = sld [smem:[#allocation6 + $0xb]]  ;;  %s743_s14 = sld [smem:[#allocation3 + $0xc]] }
  0x38   :  { %v82_v39 = vadd.f32 %v81_v32, %v71_v31  ;;  %v132_v45 = vstv %s691_s26  ;;  %v140_v46 = vstv %s697_s0  ;;  %v123_v49 = vmax.f32 %v122_v41, 0.0  ;;  %s746_s15 = sld [smem:[#allocation8 + $0xb]]  ;;  %s751_s16 = sld [smem:[#allocation6 + $0xc]] }
  0x39   :  { %v114_v48 = vmul.f32 %v113_v37, %v112_v40  ;;  %v133_v50 = vadd.f32 %v132_v45, %v130_v42  ;;  %v135_v51 = vstv %s695_s1  ;;  %v141_v52 = vmul.f32 %v140_v46, %v656_v0  ;;  %s753_s17 = sld [smem:[#allocation3 + $0xd]]  ;;  %s756_s18 = sld [smem:[#allocation8 + $0xc]] }
  0x3a   :  { %v93_v47 = vadd.f32 %v92_v35, %v82_v39  ;;  %v143_v53 = vstv %s702_s27  ;;  %v151_v54 = vstv %s704_s28  ;;  %v125_v56 = vmul.f32 %v124_v44, %v123_v49  ;;  %s761_s19 = sld [smem:[#allocation6 + $0xd]]  ;;  %s763_s4 = sld [smem:[#allocation3 + $0xe]] }
  0x3b   :  { %v134_v57 = vmax.f32 %v133_v50, 0.0  ;;  %v152_v58 = vmul.f32 %v151_v54, %v656_v0  ;;  %v144_v59 = vadd.f32 %v143_v53, %v141_v52  ;;  %v146_v60 = vstv %s708_s29  ;;  %s766_s20 = sld [smem:[#allocation8 + $0xd]]  ;;  %s771_s21 = sld [smem:[#allocation6 + $0xe]] }
  0x3c   :  { %v104_v55 = vadd.f32 %v103_v43, %v93_v47  ;;  %v154_v61 = vstv %s712_s30  ;;  %v162_v62 = vstv %s714_s6  ;;  %v157_v5 = vstv %s717_s7  ;;  %s773_s22 = sld [smem:[#allocation3 + $0xf]]  ;;  %s775_s23 = sld [smem:[#allocation8 + $0xe]] }
  0x3d   :  { %v136_v1 = vmul.f32 %v135_v51, %v134_v57  ;;  %v155_v2 = vadd.f32 %v154_v61, %v152_v58  ;;  %v163_v3 = vmul.f32 %v162_v62, %v656_v0  ;;  %v145_v4 = vmax.f32 %v144_v59, 0.0  ;;  %s781_s24 = sld [smem:[#allocation6 + $0xf]]  ;;  %s783_s25 = sld [smem:[#allocation3 + $0x10]] }
  0x3e   :  { %v115_v63 = vadd.f32 %v114_v48, %v104_v55  ;;  %v165_v6 = vstv %s721_s8  ;;  %v173_v7 = vstv %s723_s2  ;;  %v168_v13 = vstv %s726_s9  ;;  %s786_s3 = sld [smem:[#allocation8 + $0xf]]  ;;  %s791_s26 = sld [smem:[#allocation6 + $0x10]] }
  0x3f   :  { %v156_v9 = vmax.f32 %v155_v2, 0.0  ;;  %v166_v10 = vadd.f32 %v165_v6, %v163_v3  ;;  %v174_v11 = vmul.f32 %v173_v7, %v656_v0  ;;  %v147_v12 = vmul.f32 %v146_v60, %v145_v4  ;;  %s793_s1 = sld [smem:[#allocation3 + $0x11]]  ;;  %s796_s0 = sld [smem:[#allocation8 + $0x10]] }
  0x40   :  { %v126_v8 = vadd.f32 %v125_v56, %v115_v63  ;;  %v176_v14 = vstv %s731_s10  ;;  %v184_v15 = vstv %s733_s11  ;;  %v179_v20 = vstv %s735_s12  ;;  %s801_s27 = sld [smem:[#allocation6 + $0x11]]  ;;  %s803_s28 = sld [smem:[#allocation3 + $0x12]] }
  0x41   :  { %v158_v17 = vmul.f32 %v157_v5, %v156_v9  ;;  %v167_v18 = vmax.f32 %v166_v10, 0.0  ;;  %v177_v19 = vadd.f32 %v176_v14, %v174_v11  ;;  %v185_v21 = vmul.f32 %v184_v15, %v656_v0  ;;  %s806_s29 = sld [smem:[#allocation8 + $0x11]]  ;;  %s811_s30 = sld [smem:[#allocation6 + $0x12]] }
  0x42   :  { %v137_v16 = vadd.f32 %v136_v1, %v126_v8  ;;  %v187_v22 = vstv %s741_s13  ;;  %v195_v23 = vstv %s743_s14  ;;  %v190_v29 = vstv %s746_s15  ;;  %s813_s6 = sld [smem:[#allocation3 + $0x13]]  ;;  %s815_s7 = sld [smem:[#allocation8 + $0x12]] }
  0x43   :  { %v169_v25 = vmul.f32 %v168_v13, %v167_v18  ;;  %v178_v26 = vmax.f32 %v177_v19, 0.0  ;;  %v196_v27 = vmul.f32 %v195_v23, %v656_v0  ;;  %v188_v28 = vadd.f32 %v187_v22, %v185_v21  ;;  %s821_s8 = sld [smem:[#allocation6 + $0x13]]  ;;  %s823_s2 = sld [smem:[#allocation3 + $0x14]] }
  0x44   :  { %v148_v24 = vadd.f32 %v147_v12, %v137_v16  ;;  %v198_v30 = vstv %s751_s16  ;;  %v206_v31 = vstv %s753_s17  ;;  %v201_v37 = vstv %s756_s18  ;;  %s826_s9 = sld [smem:[#allocation8 + $0x13]]  ;;  %s831_s10 = sld [smem:[#allocation6 + $0x14]] }
  0x45   :  { %v180_v33 = vmul.f32 %v179_v20, %v178_v26  ;;  %v199_v34 = vadd.f32 %v198_v30, %v196_v27  ;;  %v207_v35 = vmul.f32 %v206_v31, %v656_v0  ;;  %v189_v36 = vmax.f32 %v188_v28, 0.0  ;;  %s833_s11 = sld [smem:[#allocation3 + $0x15]]  ;;  %s836_s12 = sld [smem:[#allocation8 + $0x14]] }
  0x46   :  { %v159_v32 = vadd.f32 %v158_v17, %v148_v24  ;;  %v209_v38 = vstv %s761_s19  ;;  %v217_v39 = vstv %s763_s4  ;;  %v212_v45 = vstv %s766_s20  ;;  %s841_s13 = sld [smem:[#allocation6 + $0x15]]  ;;  %s843_s14 = sld [smem:[#allocation3 + $0x16]] }
  0x47   :  { %v200_v41 = vmax.f32 %v199_v34, 0.0  ;;  %v210_v42 = vadd.f32 %v209_v38, %v207_v35  ;;  %v218_v43 = vmul.f32 %v217_v39, %v656_v0  ;;  %v191_v44 = vmul.f32 %v190_v29, %v189_v36  ;;  %s846_s15 = sld [smem:[#allocation8 + $0x15]]  ;;  %s851_s16 = sld [smem:[#allocation6 + $0x16]] }
  0x48   :  { %v170_v40 = vadd.f32 %v169_v25, %v159_v32  ;;  %v220_v46 = vstv %s771_s21  ;;  %v228_v47 = vstv %s773_s22  ;;  %v223_v52 = vstv %s775_s23  ;;  %s853_s17 = sld [smem:[#allocation3 + $0x17]]  ;;  %s855_s18 = sld [smem:[#allocation8 + $0x16]] }
  0x49   :  { %v202_v49 = vmul.f32 %v201_v37, %v200_v41  ;;  %v211_v50 = vmax.f32 %v210_v42, 0.0  ;;  %v221_v51 = vadd.f32 %v220_v46, %v218_v43  ;;  %v229_v53 = vmul.f32 %v228_v47, %v656_v0  ;;  %s861_s19 = sld [smem:[#allocation6 + $0x17]]  ;;  %s863_s4 = sld [smem:[#allocation3 + $0x18]] }
  0x4a   :  { %v181_v48 = vadd.f32 %v180_v33, %v170_v40  ;;  %v231_v54 = vstv %s781_s24  ;;  %v239_v55 = vstv %s783_s25  ;;  %v234_v61 = vstv %s786_s3  ;;  %s866_s20 = sld [smem:[#allocation8 + $0x17]]  ;;  %s871_s21 = sld [smem:[#allocation6 + $0x18]] }
  0x4b   :  { %v213_v57 = vmul.f32 %v212_v45, %v211_v50  ;;  %v222_v58 = vmax.f32 %v221_v51, 0.0  ;;  %v240_v59 = vmul.f32 %v239_v55, %v656_v0  ;;  %v232_v60 = vadd.f32 %v231_v54, %v229_v53  ;;  %s873_s22 = sld [smem:[#allocation3 + $0x19]]  ;;  %s876_s23 = sld [smem:[#allocation8 + $0x18]] }
  0x4c   :  { %v192_v56 = vadd.f32 %v191_v44, %v181_v48  ;;  %v242_v62 = vstv %s791_s26  ;;  %v250_v63 = vstv %s793_s1  ;;  %v245_v6 = vstv %s796_s0  ;;  %s881_s24 = sld [smem:[#allocation6 + $0x19]]  ;;  %s883_s25 = sld [smem:[#allocation3 + $0x1a]] }
  0x4d   :  { %v224_v2 = vmul.f32 %v223_v52, %v222_v58  ;;  %v243_v3 = vadd.f32 %v242_v62, %v240_v59  ;;  %v251_v4 = vmul.f32 %v250_v63, %v656_v0  ;;  %v233_v5 = vmax.f32 %v232_v60, 0.0  ;;  %s886_s3 = sld [smem:[#allocation8 + $0x19]]  ;;  %s891_s26 = sld [smem:[#allocation6 + $0x1a]] }
  0x4e   :  { %v203_v1 = vadd.f32 %v202_v49, %v192_v56  ;;  %v253_v7 = vstv %s801_s27  ;;  %v261_v8 = vstv %s803_s28  ;;  %v256_v14 = vstv %s806_s29  ;;  %s893_s1 = sld [smem:[#allocation3 + $0x1b]]  ;;  %s895_s0 = sld [smem:[#allocation8 + $0x1a]] }
  0x4f   :  { %v244_v10 = vmax.f32 %v243_v3, 0.0  ;;  %v254_v11 = vadd.f32 %v253_v7, %v251_v4  ;;  %v262_v12 = vmul.f32 %v261_v8, %v656_v0  ;;  %v235_v13 = vmul.f32 %v234_v61, %v233_v5  ;;  %s901_s27 = sld [smem:[#allocation6 + $0x1b]]  ;;  %s903_s28 = sld [smem:[#allocation3 + $0x1c]] }
  0x50   :  { %v214_v9 = vadd.f32 %v213_v57, %v203_v1  ;;  %v264_v15 = vstv %s811_s30  ;;  %v272_v16 = vstv %s813_s6  ;;  %v267_v21 = vstv %s815_s7  ;;  %s906_s29 = sld [smem:[#allocation8 + $0x1b]]  ;;  %s911_s30 = sld [smem:[#allocation6 + $0x1c]] }
  0x51   :  { %v246_v18 = vmul.f32 %v245_v6, %v244_v10  ;;  %v255_v19 = vmax.f32 %v254_v11, 0.0  ;;  %v265_v20 = vadd.f32 %v264_v15, %v262_v12  ;;  %v273_v22 = vmul.f32 %v272_v16, %v656_v0  ;;  %s913_s6 = sld [smem:[#allocation3 + $0x1d]]  ;;  %s916_s7 = sld [smem:[#allocation8 + $0x1c]] }
  0x52   :  { %v225_v17 = vadd.f32 %v224_v2, %v214_v9  ;;  %v275_v23 = vstv %s821_s8  ;;  %v283_v24 = vstv %s823_s2  ;;  %v278_v30 = vstv %s826_s9  ;;  %s921_s8 = sld [smem:[#allocation6 + $0x1d]]  ;;  %s923_s2 = sld [smem:[#allocation3 + $0x1e]] }
  0x53   :  { %v257_v26 = vmul.f32 %v256_v14, %v255_v19  ;;  %v266_v27 = vmax.f32 %v265_v20, 0.0  ;;  %v284_v28 = vmul.f32 %v283_v24, %v656_v0  ;;  %v276_v29 = vadd.f32 %v275_v23, %v273_v22  ;;  %s926_s9 = sld [smem:[#allocation8 + $0x1d]] }
  0x54   :  { %v236_v25 = vadd.f32 %v235_v13, %v225_v17  ;;  %v286_v31 = vstv %s831_s10  ;;  %v294_v32 = vstv %s833_s11  ;;  %v289_v38 = vstv %s836_s12  ;;  %s931_s10 = sld [smem:[#allocation6 + $0x1e]]  ;;  %s933_s11 = sld [smem:[#allocation3 + $0x1f]] }
  0x55   :  { %v268_v34 = vmul.f32 %v267_v21, %v266_v27  ;;  %v287_v35 = vadd.f32 %v286_v31, %v284_v28  ;;  %v295_v36 = vmul.f32 %v294_v32, %v656_v0  ;;  %v277_v37 = vmax.f32 %v276_v29, 0.0  ;;  %s939_s12 = sld [smem:[#allocation8 + $0x1e]] }
  0x56   :  { %v247_v33 = vadd.f32 %v246_v18, %v236_v25  ;;  %v297_v39 = vstv %s841_s13  ;;  %v305_v40 = vstv %s843_s14  ;;  %v300_v46 = vstv %s846_s15  ;;  %s941_s13 = sld [smem:[#allocation6 + $0x1f]]  ;;  %s605_s15 = smov [#allocation9]  }
  0x57   :  { %v288_v42 = vmax.f32 %v287_v35, 0.0  ;;  %v298_v43 = vadd.f32 %v297_v39, %v295_v36  ;;  %v306_v44 = vmul.f32 %v305_v40, %v656_v0  ;;  %v279_v45 = vmul.f32 %v278_v30, %v277_v37  ;;  %s526_s14 = sld [smem:[#allocation8 + $0x1f]] }
  0x58   :  { %v258_v41 = vadd.f32 %v257_v26, %v247_v33  ;;  %v308_v47 = vstv %s851_s16  ;;  %v316_v48 = vstv %s853_s17  ;;  %v311_v53 = vstv %s855_s18  ;;  %s426_s16 = sshll.u32 %s605_s15, 4  ;;  %s427_s16 = int_to_ptr.vmem [resolvable:$true] %s426_s16 }
  0x59   :  { %v290_v50 = vmul.f32 %v289_v38, %v288_v42  ;;  %v299_v51 = vmax.f32 %v298_v43, 0.0  ;;  %v309_v52 = vadd.f32 %v308_v47, %v306_v44  ;;  %v317_v54 = vmul.f32 %v316_v48, %v656_v0  ;;  %s574_s17 = scalar_lea.vmem %s427_s16, 128  ;;  %p579_p2 = scmp.lt.s32.totalorder %s427_s16, %s427_s16 }
  0x5a   :  { %v269_v49 = vadd.f32 %v268_v34, %v258_v41  ;;  %v319_v55 = vstv %s861_s19  ;;  %v327_v56 = vstv %s863_s4  ;;  %v322_v62 = vstv %s866_s20  ;;  %p575_p1 = scmp.ne.s32.totalorder %s427_s16, %s574_s17  ;;  %p580_p3 = scmp.lt.s32.totalorder %s574_s17, %s574_s17 }
  0x5b   :  { %v301_v58 = vmul.f32 %v300_v46, %v299_v51  ;;  %v310_v59 = vmax.f32 %v309_v52, 0.0  ;;  %v328_v60 = vmul.f32 %v327_v56, %v656_v0  ;;  %v320_v61 = vadd.f32 %v319_v55, %v317_v54 }
  0x5c   :  { %v280_v57 = vadd.f32 %v279_v45, %v269_v49  ;;  %v330_v63 = vstv %s871_s21  ;;  %v338_v1 = vstv %s873_s22  ;;  %v333_v7 = vstv %s876_s23  ;;  %p581_p4 = por %p580_p3, %p579_p2 }
  0x5d   :  { %v312_v3 = vmul.f32 %v311_v53, %v310_v59  ;;  %v331_v4 = vadd.f32 %v330_v63, %v328_v60  ;;  %v339_v5 = vmul.f32 %v338_v1, %v656_v0  ;;  %v321_v6 = vmax.f32 %v320_v61, 0.0 }
  0x5e   :  { %v291_v2 = vadd.f32 %v290_v50, %v280_v57  ;;  %v341_v8 = vstv %s881_s24  ;;  %v349_v9 = vstv %s883_s25  ;;  %v344_v15 = vstv %s886_s3  ;;  %p582_p5 = pnand %p581_p4, %p575_p1 }
  0x5f   :  { %v332_v11 = vmax.f32 %v331_v4, 0.0  ;;  %v342_v12 = vadd.f32 %v341_v8, %v339_v5  ;;  %v350_v13 = vmul.f32 %v349_v9, %v656_v0  ;;  %v323_v14 = vmul.f32 %v322_v62, %v321_v6 }
  0x60   :  { %v302_v10 = vadd.f32 %v301_v58, %v291_v2  ;;  %v352_v16 = vstv %s891_s26  ;;  %v360_v17 = vstv %s893_s1  ;;  %v355_v22 = vstv %s895_s0 }
  0x61   :  { %v334_v19 = vmul.f32 %v333_v7, %v332_v11  ;;  %v343_v20 = vmax.f32 %v342_v12, 0.0  ;;  %v353_v21 = vadd.f32 %v352_v16, %v350_v13  ;;  %v361_v23 = vmul.f32 %v360_v17, %v656_v0 }
  0x62   :  { %v313_v18 = vadd.f32 %v312_v3, %v302_v10  ;;  %v363_v24 = vstv %s901_s27  ;;  %v371_v25 = vstv %s903_s28  ;;  %v366_v31 = vstv %s906_s29 }
  0x63   :  { %v345_v27 = vmul.f32 %v344_v15, %v343_v20  ;;  %v354_v28 = vmax.f32 %v353_v21, 0.0  ;;  %v372_v29 = vmul.f32 %v371_v25, %v656_v0  ;;  %v364_v30 = vadd.f32 %v363_v24, %v361_v23 }
  0x64   :  { %v324_v26 = vadd.f32 %v323_v14, %v313_v18  ;;  %v374_v32 = vstv %s911_s30  ;;  %v382_v33 = vstv %s913_s6  ;;  %v377_v39 = vstv %s916_s7 }
  0x65   :  { %v356_v35 = vmul.f32 %v355_v22, %v354_v28  ;;  %v375_v36 = vadd.f32 %v374_v32, %v372_v29  ;;  %v383_v37 = vmul.f32 %v382_v33, %v656_v0  ;;  %v365_v38 = vmax.f32 %v364_v30, 0.0 }
  0x66   :  { %v335_v34 = vadd.f32 %v334_v19, %v324_v26  ;;  %v385_v40 = vstv %s921_s8  ;;  %v393_v41 = vstv %s923_s2  ;;  %v388_v47 = vstv %s926_s9 }
  0x67   :  { %v376_v43 = vmax.f32 %v375_v36, 0.0  ;;  %v386_v44 = vadd.f32 %v385_v40, %v383_v37  ;;  %v394_v45 = vmul.f32 %v393_v41, %v656_v0  ;;  %v367_v46 = vmul.f32 %v366_v31, %v365_v38 }
  0x68   :  { %v346_v42 = vadd.f32 %v345_v27, %v335_v34  ;;  %v396_v48 = vstv %s931_s10  ;;  %v404_v49 = vstv %s933_s11  ;;  %v399_v54 = vstv %s939_s12 }
  0x69   :  { %v378_v51 = vmul.f32 %v377_v39, %v376_v43  ;;  %v387_v52 = vmax.f32 %v386_v44, 0.0  ;;  %v397_v53 = vadd.f32 %v396_v48, %v394_v45  ;;  %v405_v55 = vmul.f32 %v404_v49, %v656_v0 }
  0x6a   :  { %v357_v50 = vadd.f32 %v356_v35, %v346_v42  ;;  %v407_v56 = vstv %s941_s13  ;;  %v410_v63 = vstv %s526_s14 }
  0x6b   :  { %v389_v58 = vmul.f32 %v388_v47, %v387_v52  ;;  %v398_v59 = vmax.f32 %v397_v53, 0.0  ;;  %v408_v60 = vadd.f32 %v407_v56, %v405_v55 }
  0x6c   :  { %v368_v57 = vadd.f32 %v367_v46, %v357_v50 }
  0x6d   :  { %v400_v62 = vmul.f32 %v399_v54, %v398_v59  ;;  %v409_v1 = vmax.f32 %v408_v60, 0.0 }
  0x6e   :  { %v379_v61 = vadd.f32 %v378_v51, %v368_v57 }
  0x6f   :  { %v411_v3 = vmul.f32 %v410_v63, %v409_v1 }
  0x70   :  { %v390_v2 = vadd.f32 %v389_v58, %v379_v61 }
  0x72   :  { %v401_v4 = vadd.f32 %v400_v62, %v390_v2 }
  0x74   :  { %v412_v5 = vadd.f32 %v411_v3, %v401_v4 }
  0x76   :  { %v529_v6 = vmul.f32 -1.442695, %v412_v5 }
  0x78   :  { %534 = vpow2.f32 %v529_v6 }
  0x82   :  { %v535_v7 = vpop.eup %534 }
  0x83   :  { %v416_v8 = vadd.f32 1.0, %v535_v7 }
  0x85   :  { %536 = vrcp.f32 %v416_v8 }
  0x8f   :  { %v537_v0 = vpop.eup %536 }
  0x90   :  { %419 = vst [vmem:[#allocation9] sm:$0xff] %v537_v0 }
  0x91   :  { %585 = shalt.err (!%p582_p5)
}
  0x92   :  { %s586_s4 = scalar_lea.hbm %s975_s5, 128 }
  0x93   :  { %p587_p6 = scmp.ne.s32.totalorder %s975_s5, %s586_s4  ;;  %p590_p7 = scmp.lt.u32.totalorder %s586_s4, %s975_s5 }
  0x95   :  { %p592_p8 = pnand %p590_p7, %p587_p6 }
  0x97   :  { %595 = shalt.err (!%p592_p8)
}
  0x98   :  { %429 = dma.vmem_to_hbm [thread:$0]  %s427_s16, 128, %s975_s5, [#allocation4]  }
  0x99   :  { %600 = dma.done.wait [#allocation4], 128  }
  0x9a   :  { %601 = vsyncadd [#allocation4], 4294967168 }
  0x9b   :  { %433 = vsyncpa [#allocation4], 1 }
  0x9c   :  { %434 = vsyncpa [#allocation5], 1 }
  0x9d   :  { %435 = vsyncpa [#allocation7], 1 }

</bundles_post_ra>
